<compile_context>
chip_gen: v7x
topology: tpu7x:2x2x1
jax: 0.10.0
libtpu: 0.0.40
codegen_flags: <defaults>
</compile_context>

<pallas_src>
import jax
import jax.numpy as jnp
import numpy as np
from jax import lax
from jax.experimental import pallas as pl
from jax.experimental.pallas import tpu as pltpu

HIDDEN = 64
OUTPUT = 10
KSIZE = 7
STRIDE = 3
CONV_OUT_C = 4
IMG = 28                                   # 28x28 input -> 8x8 conv output -> 4*8*8 = 256
H_OUT = (IMG - KSIZE) // STRIDE + 1        # 8
FEAT = CONV_OUT_C * H_OUT * H_OUT          # 256
NPIX = IMG * IMG                           # 784
HPAD = 128                                 # hidden padded to full lane width
OPAD = 128                                 # output padded to full lane width
MAX_BB = 512                               # fixed row tile cap (fits 16 MiB scoped VMEM on v5e)


def _fused_kernel(x_ref, wc_ref, bc_ref, w1_ref, b1_ref, w2_ref, b2_ref, o_ref):
    # conv (as dense matmul over flattened pixels) + bias, then square -- all in VMEM
    x = x_ref[...].astype(jnp.bfloat16)
    y = jnp.dot(x, wc_ref[...], preferred_element_type=jnp.float32) + bc_ref[...]
    y = y * y                                                     # (bb, 256) f32
    # fc1 + square (hidden zero-padded 64 -> 128; pad columns stay exactly 0)
    h = jnp.dot(y.astype(jnp.bfloat16), w1_ref[...],
                preferred_element_type=jnp.float32) + b1_ref[...]
    h = h * h                                                     # (bb, 128) f32
    # fc2 (output zero-padded 10 -> 128; sliced off / consumed downstream)
    o_ref[...] = jnp.dot(h.astype(jnp.bfloat16), w2_ref[...],
                         preferred_element_type=jnp.float32) + b2_ref[...]


def prepare_params(params):
    """One-time parameter prep, hoisted out of the hot forward path."""
    conv_w, conv_b, fc1_w, fc1_b, fc2_w, fc2_b = params
    # Dense (784, 256) equivalent of the stride-3 VALID conv, built by pushing the
    # 784 one-hot images through the (bias-free) conv.  Column order is PyTorch's
    # (C, H, W) flatten, so fc1 weights are used unpermuted.
    eye = jnp.eye(NPIX, dtype=jnp.float32).reshape(NPIX, 1, IMG, IMG)
    wc = lax.conv_general_dilated(
        eye, conv_w, window_strides=(STRIDE, STRIDE), padding="VALID",
        dimension_numbers=("NCHW", "OIHW", "NCHW")).reshape(NPIX, FEAT)
    bc = jnp.repeat(conv_b, H_OUT * H_OUT).reshape(1, FEAT)
    # fc1 / fc2 zero-padded to 128-wide lane-dense slabs (zeros are exact).
    w1 = jnp.zeros((FEAT, HPAD), jnp.float32).at[:, :HIDDEN].set(fc1_w.T)
    b1 = jnp.zeros((1, HPAD), jnp.float32).at[:, :HIDDEN].set(fc1_b)
    w2 = jnp.zeros((HPAD, OPAD), jnp.float32).at[:HIDDEN, :OUTPUT].set(fc2_w.T)
    b2 = jnp.zeros((1, OPAD), jnp.float32).at[:, :OUTPUT].set(fc2_b)
    # bf16 matmul operands (f32 accumulation in-kernel); biases stay f32.
    return (wc.astype(jnp.bfloat16), bc,
            w1.astype(jnp.bfloat16), b1,
            w2.astype(jnp.bfloat16), b2)


def _pick_batch_tile(B):
    """Fixed row tile; the cdiv grid masks the ragged last block, so no
    divisibility requirement on B.

    * bb <= 512: double-buffered (512,784) f32 input blocks + resident weights +
      f32 intermediates total ~7 MiB, well under the scoped-VMEM defaults
      (16 MiB v5e, 32 MiB v6e/v7x) and far under v7x's 64 MiB physical VMEM.
    * For B <= 512 the tile is capped near B/2 (rounded up to a multiple of 8)
      so the grid has >=2 steps and both v7x TensorCores get work.
    """
    bb = MAX_BB
    if B <= bb:
        half = max(8, ((B + 15) // 16) * 8)    # ~ceil(B/2), multiple of 8
        bb = min(bb, half)
    return bb


def convnet_forward(x, prepped, *, return_padded=False):
    """x: (B, 1, 28, 28) float32 (or bfloat16) NCHW.

    Returns (B, 10) float32 logits, or the lane-dense (B, 128) padded slab
    (columns 10..127 are exact zeros of the padded fc2) if return_padded=True,
    which skips the external slice pass for consumers that can handle it.
    """
    wc, bc, w1, b1, w2, b2 = prepped
    B = x.shape[0]
    x_flat = x.reshape(B, NPIX)            # free reshape, no data movement
    bb = _pick_batch_tile(B)

    out = pl.pallas_call(
        _fused_kernel,
        out_shape=jax.ShapeDtypeStruct((B, OPAD), jnp.float32),
        grid=(pl.cdiv(B, bb),),
        in_specs=[
            pl.BlockSpec((bb, NPIX), lambda i: (i, 0)),     # image rows (pipelined)
            pl.BlockSpec((NPIX, FEAT), lambda i: (0, 0)),   # conv-as-dense weights (resident)
            pl.BlockSpec((1, FEAT), lambda i: (0, 0)),
            pl.BlockSpec((FEAT, HPAD), lambda i: (0, 0)),
            pl.BlockSpec((1, HPAD), lambda i: (0, 0)),
            pl.BlockSpec((HPAD, OPAD), lambda i: (0, 0)),
            pl.BlockSpec((1, OPAD), lambda i: (0, 0)),
        ],
        out_specs=pl.BlockSpec((bb, OPAD), lambda i: (i, 0)),
        compiler_params=pltpu.CompilerParams(dimension_semantics=("parallel",)),
    )(x_flat, wc, bc, w1, b1, w2, b2)

    if return_padded:
        return out
    return out[:, :OUTPUT]


def reference_forward(x, params):
    """Pure-JAX reference mirroring the PyTorch forward exactly (f32)."""
    conv_w, conv_b, fc1_w, fc1_b, fc2_w, fc2_b = params
    y = lax.conv_general_dilated(
        x, conv_w, window_strides=(STRIDE, STRIDE), padding="VALID",
        dimension_numbers=("NCHW", "OIHW", "NCHW"))
    y = y + conv_b[None, :, None, None]
    y = y * y
    y = y.reshape(-1, FEAT)
    h = y @ fc1_w.T + fc1_b
    h = h * h
    return h @ fc2_w.T + fc2_b


if __name__ == "__main__":
    B = 4
    key = jax.random.PRNGKey(0)
    kx, k1, k2, k3, k4, k5, k6 = jax.random.split(key, 7)

    x = jax.random.normal(kx, (B, 1, IMG, IMG), jnp.float32)

    # deterministic synthetic parameters (PyTorch shape conventions)
    conv_w = 0.10 * jax.random.normal(k1, (CONV_OUT_C, 1, KSIZE, KSIZE), jnp.float32)
    conv_b = 0.10 * jax.random.normal(k2, (CONV_OUT_C,), jnp.float32)
    fc1_w = 0.05 * jax.random.normal(k3, (HIDDEN, FEAT), jnp.float32)
    fc1_b = 0.05 * jax.random.normal(k4, (HIDDEN,), jnp.float32)
    fc2_w = 0.10 * jax.random.normal(k5, (OUTPUT, HIDDEN), jnp.float32)
    fc2_b = 0.10 * jax.random.normal(k6, (OUTPUT,), jnp.float32)
    params = (conv_w, conv_b, fc1_w, fc1_b, fc2_w, fc2_b)

    prepped = jax.block_until_ready(prepare_params(params))   # one-time, outside hot path

    out = jax.jit(convnet_forward)(x, prepped)
    out = jax.block_until_ready(out)
    assert out.shape == (B, OUTPUT)

    ref = jax.block_until_ready(reference_forward(x, params))
    np.testing.assert_allclose(np.asarray(out), np.asarray(ref), rtol=5e-2, atol=2e-2)

    # Also exercise a ragged batch (B not a multiple of the row tile) to check
    # the cdiv grid + masked last block path.
    B2 = 11
    x2 = jax.random.normal(jax.random.PRNGKey(1), (B2, 1, IMG, IMG), jnp.float32)
    out2 = jax.block_until_ready(jax.jit(convnet_forward)(x2, prepped))
    ref2 = jax.block_until_ready(reference_forward(x2, params))
    assert out2.shape == (B2, OUTPUT)
    np.testing.assert_allclose(np.asarray(out2), np.asarray(ref2), rtol=5e-2, atol=2e-2)

    print("KERNEL_OK")
</pallas_src>

<mosaic_0001>
module attributes {stable_mosaic.version = 11 : i64} {
  func.func @_fused_kernel(%arg0: i32, %arg1: memref<8x784xf32, #tpu.memory_space<vmem>>, %arg2: memref<784x256xbf16, #tpu.memory_space<vmem>>, %arg3: memref<1x256xf32, #tpu.memory_space<vmem>>, %arg4: memref<256x128xbf16, #tpu.memory_space<vmem>>, %arg5: memref<1x128xf32, #tpu.memory_space<vmem>>, %arg6: memref<128x128xbf16, #tpu.memory_space<vmem>>, %arg7: memref<1x128xf32, #tpu.memory_space<vmem>>, %arg8: memref<8x128xf32, #tpu.memory_space<vmem>>) attributes {dimension_semantics = [#tpu.dimension_semantics<parallel>], iteration_bounds = array<i64: 1>, scalar_prefetch = 0 : i64, scratch_operands = 0 : i64, tpu.core_type = #tpu.core_type<tc>, window_params = [{transform_indices = @transform_0, window_bounds = array<i64: 8, 784>}, {pipeline_mode = #tpu.pipeline_mode<synchronous>, transform_indices = @transform_1, window_bounds = array<i64: 784, 256>}, {pipeline_mode = #tpu.pipeline_mode<synchronous>, transform_indices = @transform_2, window_bounds = array<i64: 1, 256>}, {pipeline_mode = #tpu.pipeline_mode<synchronous>, transform_indices = @transform_3, window_bounds = array<i64: 256, 128>}, {pipeline_mode = #tpu.pipeline_mode<synchronous>, transform_indices = @transform_4, window_bounds = array<i64: 1, 128>}, {pipeline_mode = #tpu.pipeline_mode<synchronous>, transform_indices = @transform_5, window_bounds = array<i64: 128, 128>}, {pipeline_mode = #tpu.pipeline_mode<synchronous>, transform_indices = @transform_6, window_bounds = array<i64: 1, 128>}, {transform_indices = @transform_7, window_bounds = array<i64: 8, 128>}]} {
    %c0 = arith.constant 0 : index
    %c0_0 = arith.constant 0 : index
    %0 = vector.load %arg1[%c0, %c0_0] : memref<8x784xf32, #tpu.memory_space<vmem>>, vector<8x784xf32>
    %1 = arith.truncf %0 : vector<8x784xf32> to vector<8x784xbf16>
    %c0_1 = arith.constant 0 : index
    %c0_2 = arith.constant 0 : index
    %2 = vector.load %arg2[%c0_1, %c0_2] : memref<784x256xbf16, #tpu.memory_space<vmem>>, vector<784x256xbf16>
    %cst = arith.constant dense<0.000000e+00> : vector<8x256xf32>
    %3 = tpu.matmul %1, %2, %cst {dimension_numbers = #tpu.dot_dimension_numbers<[1], [0], [0], [1], [0, 0, 1, 1], [], []>} : vector<8x784xbf16>, vector<784x256xbf16>, vector<8x256xf32> -> vector<8x256xf32>
    %c0_3 = arith.constant 0 : index
    %c0_4 = arith.constant 0 : index
    %4 = vector.load %arg3[%c0_3, %c0_4] : memref<1x256xf32, #tpu.memory_space<vmem>>, vector<1x256xf32>
    %5 = vector.broadcast %4 : vector<1x256xf32> to vector<8x256xf32>
    %6 = arith.addf %3, %5 : vector<8x256xf32>
    %7 = arith.mulf %6, %6 : vector<8x256xf32>
    %8 = arith.truncf %7 : vector<8x256xf32> to vector<8x256xbf16>
    %c0_5 = arith.constant 0 : index
    %c0_6 = arith.constant 0 : index
    %9 = vector.load %arg4[%c0_5, %c0_6] : memref<256x128xbf16, #tpu.memory_space<vmem>>, vector<256x128xbf16>
    %cst_7 = arith.constant dense<0.000000e+00> : vector<8x128xf32>
    %10 = tpu.matmul %8, %9, %cst_7 {dimension_numbers = #tpu.dot_dimension_numbers<[1], [0], [0], [1], [0, 0, 1, 1], [], []>} : vector<8x256xbf16>, vector<256x128xbf16>, vector<8x128xf32> -> vector<8x128xf32>
    %c0_8 = arith.constant 0 : index
    %c0_9 = arith.constant 0 : index
    %11 = vector.load %arg5[%c0_8, %c0_9] : memref<1x128xf32, #tpu.memory_space<vmem>>, vector<1x128xf32>
    %12 = vector.broadcast %11 : vector<1x128xf32> to vector<8x128xf32>
    %13 = arith.addf %10, %12 : vector<8x128xf32>
    %14 = arith.mulf %13, %13 : vector<8x128xf32>
    %15 = arith.truncf %14 : vector<8x128xf32> to vector<8x128xbf16>
    %c0_10 = arith.constant 0 : index
    %c0_11 = arith.constant 0 : index
    %16 = vector.load %arg6[%c0_10, %c0_11] : memref<128x128xbf16, #tpu.memory_space<vmem>>, vector<128x128xbf16>
    %cst_12 = arith.constant dense<0.000000e+00> : vector<8x128xf32>
    %17 = tpu.matmul %15, %16, %cst_12 {dimension_numbers = #tpu.dot_dimension_numbers<[1], [0], [0], [1], [0, 0, 1, 1], [], []>} : vector<8x128xbf16>, vector<128x128xbf16>, vector<8x128xf32> -> vector<8x128xf32>
    %c0_13 = arith.constant 0 : index
    %c0_14 = arith.constant 0 : index
    %18 = vector.load %arg7[%c0_13, %c0_14] : memref<1x128xf32, #tpu.memory_space<vmem>>, vector<1x128xf32>
    %19 = vector.broadcast %18 : vector<1x128xf32> to vector<8x128xf32>
    %20 = arith.addf %17, %19 : vector<8x128xf32>
    %c0_15 = arith.constant 0 : index
    %c0_16 = arith.constant 0 : index
    %21 = vector.load %arg8[%c0_15, %c0_16] : memref<8x128xf32, #tpu.memory_space<vmem>>, vector<8x128xf32>
    tpu.vector_store %arg8[%c0_15, %c0_16], %20 {strides = array<i32>} : memref<8x128xf32, #tpu.memory_space<vmem>>, vector<8x128xf32>,
    return
  }
  func.func @transform_0(%arg0: i32) -> (i32, i32) {
    %c0_i32 = arith.constant 0 : i32
    %c0_i32_0 = arith.constant 0 : i32
    return %arg0, %c0_i32 : i32, i32
  }
  func.func @transform_1(%arg0: i32) -> (i32, i32) {
    %c0_i32 = arith.constant 0 : i32
    %c0_i32_0 = arith.constant 0 : i32
    %c0_i32_1 = arith.constant 0 : i32
    return %c0_i32, %c0_i32_0 : i32, i32
  }
  func.func @transform_2(%arg0: i32) -> (i32, i32) {
    %c0_i32 = arith.constant 0 : i32
    %c0_i32_0 = arith.constant 0 : i32
    %c0_i32_1 = arith.constant 0 : i32
    return %c0_i32, %c0_i32_0 : i32, i32
  }
  func.func @transform_3(%arg0: i32) -> (i32, i32) {
    %c0_i32 = arith.constant 0 : i32
    %c0_i32_0 = arith.constant 0 : i32
    %c0_i32_1 = arith.constant 0 : i32
    return %c0_i32, %c0_i32_0 : i32, i32
  }
  func.func @transform_4(%arg0: i32) -> (i32, i32) {
    %c0_i32 = arith.constant 0 : i32
    %c0_i32_0 = arith.constant 0 : i32
    %c0_i32_1 = arith.constant 0 : i32
    return %c0_i32, %c0_i32_0 : i32, i32
  }
  func.func @transform_5(%arg0: i32) -> (i32, i32) {
    %c0_i32 = arith.constant 0 : i32
    %c0_i32_0 = arith.constant 0 : i32
    %c0_i32_1 = arith.constant 0 : i32
    return %c0_i32, %c0_i32_0 : i32, i32
  }
  func.func @transform_6(%arg0: i32) -> (i32, i32) {
    %c0_i32 = arith.constant 0 : i32
    %c0_i32_0 = arith.constant 0 : i32
    %c0_i32_1 = arith.constant 0 : i32
    return %c0_i32, %c0_i32_0 : i32, i32
  }
  func.func @transform_7(%arg0: i32) -> (i32, i32) {
    %c0_i32 = arith.constant 0 : i32
    %c0_i32_0 = arith.constant 0 : i32
    return %arg0, %c0_i32 : i32, i32
  }
}

</mosaic_0001>

<bundles_post_ra>
// kernel: convnet_forward.1
= control target key start
LH: loop header
LB: loop body
LE: loop exit
PB: predicated region body
PF: predicated region fallthrough
CT: control target
= control target key end

     0   :  { %12 = vsyncpa [#allocation3], 0  ;;  %s1758_s0 = inlined_call_operand.vmem [shape: f32[4,784], index: 0, kind: input, shape index: {}]   ;;  %s1759_s1 = inlined_call_operand.hbm [shape: bf16[784,256], index: 1, kind: input, shape index: {}]   ;;  %s1760_s2 = inlined_call_operand.vmem [shape: f32[1,256], index: 2, kind: input, shape index: {}]   ;;  %s1761_s3 = inlined_call_operand.vmem [shape: bf16[256,128], index: 3, kind: input, shape index: {}]   ;;  %s1762_s4 = inlined_call_operand.vmem [shape: f32[1,128], index: 4, kind: input, shape index: {}]   ;;  %s1763_s5 = inlined_call_operand.vmem [shape: bf16[128,128], index: 5, kind: input, shape index: {}]   ;;  %s1764_s6 = inlined_call_operand.vmem [shape: f32[1,128], index: 6, kind: input, shape index: {}]   ;;  %s1765_s7 = inlined_call_operand.hbm [shape: f32[4,128], index: 7, kind: output, shape index: {}]  }
   0x1   :  { %13 = vsyncpa [#allocation4], 0  ;;  %s1583_s24 = smov [#allocation2]   ;;  %s1535_s28 = scalar_lea.hbm %s1759_s1, 12544 }
   0x2   :  { %s21_s25 = sshll.u32 %s1583_s24, 4  ;;  %p1536_p0 = scmp.ne.s32.totalorder %s1759_s1, %s1535_s28  ;;  %s22_s25 = int_to_ptr.vmem [resolvable:$true] %s21_s25 }
   0x3   :  { %p1539_p1 = scmp.lt.u32.totalorder %s1535_s28, %s1759_s1 }
   0x5   :  { %p1541_p2 = pnand %p1539_p1, %p1536_p0 }
   0x7   :  { %1544 = shalt.err (!%p1541_p2)
}
   0x8   :  { %s1545_s10 = scalar_lea.vmem %s22_s25, 12544  ;;  %p1550_p4 = scmp.lt.s32.totalorder %s22_s25, %s22_s25 }
   0x9   :  { %p1546_p3 = scmp.ne.s32.totalorder %s22_s25, %s1545_s10  ;;  %p1551_p5 = scmp.lt.s32.totalorder %s1545_s10, %s1545_s10 }
   0xb   :  { %p1552_p6 = por %p1551_p5, %p1550_p4 }
   0xd   :  { %p1553_p7 = pnand %p1552_p6, %p1546_p3 }
   0xf   :  { %1556 = shalt.err (!%p1553_p7)
}
  0x10   :  { %s1584_s11 = smov 128   ;;  %s1585_s12 = smov 8  }
  0x11   :  { %27 = dma.hbm_to_vmem [thread:$0]  %s1759_s1, 12544, %s22_s25, [#allocation3], %s1584_s11, %s1584_s11, %s1585_s12  }
  0x12   :  { %1579 = dma.done.wait [#allocation3], 12544  }
  0x13   :  { %1580 = vsyncadd [#allocation3], 4294954752  ;;  %v1354_v0 = vld [vmem:[#allocation2 + $0x104] ss:$8 sps:$4 sm:$0xff]   ;;  %v1356_v1 = vld [vmem:[#allocation2 + $0x100] ss:$8 sps:$4 sm:$0xff]  }
  0x14   :  { %724 = vmatprep.subr.bf16.mxu0 %v1354_v0  ;;  %v1357_v2 = vld [vmem:[#allocation2 + $0x114] ss:$8 sps:$4 sm:$0xff]   ;;  %v1359_v3 = vld [vmem:[#allocation2 + $0x110] ss:$8 sps:$4 sm:$0xff]   ;;  %v1360_v4 = vld [vmem:[#allocation2 + $0x124] ss:$8 sps:$4 sm:$0xff]  }
  0x15   :  { %725 = vmatpush1.bf16.msra.mxu0 %v1356_v1  ;;  %v1362_v5 = vld [vmem:[#allocation2 + $0x120] ss:$8 sps:$4 sm:$0xff]   ;;  %v1363_v6 = vld [vmem:[#allocation2 + $0x134] ss:$8 sps:$4 sm:$0xff]   ;;  %v1365_v7 = vld [vmem:[#allocation2 + $0x130] ss:$8 sps:$4 sm:$0xff]  }
  0x16   :  { %726 = vmatprep.subr.bf16.mxu0 %v1357_v2  ;;  %v1366_v8 = vld [vmem:[#allocation2 + $0x144] ss:$8 sps:$4 sm:$0xff]   ;;  %v1368_v9 = vld [vmem:[#allocation2 + $0x140] ss:$8 sps:$4 sm:$0xff]   ;;  %v1369_v10 = vld [vmem:[#allocation2 + $0x154] ss:$8 sps:$4 sm:$0xff]  }
  0x17   :  { %v1371_v11 = vld [vmem:[#allocation2 + $0x150] ss:$8 sps:$4 sm:$0xff]   ;;  %v1372_v12 = vld [vmem:[#allocation2 + $0x164] ss:$8 sps:$4 sm:$0xff]   ;;  %v1374_v14 = vld [vmem:[#allocation2 + $0x160] ss:$8 sps:$4 sm:$0xff]  }
  0x18   :  { %v1404_v13 = vld [vmem:[%s1758_s0 + $0xc] ss:$28 sps:$4 sm:$0xff]   ;;  %v1375_v15 = vld [vmem:[#allocation2 + $0x174] ss:$8 sps:$4 sm:$0xff]   ;;  %v1377_v18 = vld [vmem:[#allocation2 + $0x170] ss:$8 sps:$4 sm:$0xff]  }
  0x19   :  { %727 = vmatpush1.bf16.msra.mxu0 %v1359_v3  ;;  %v75_v16 = vpack.c.bf16 %v1404_v13, %v1404_v13  ;;  %v1411_v17 = vld [vmem:[#allocation2 + $0x4] ss:$8 sps:$4 sm:$0xff]   ;;  %v1416_v20 = vld [vmem:[#allocation2] ss:$8 sps:$4 sm:$0xff]   ;;  %v1417_v21 = vld [vmem:[#allocation2 + $0x14] ss:$8 sps:$4 sm:$0xff]  }
  0x1a   :  { %728 = vmatprep.subr.bf16.mxu0 %v1360_v4  ;;  %v1378_v19 = vld [vmem:[#allocation2 + $0x184] ss:$8 sps:$4 sm:$0xff]   ;;  %683 = vmatprep.subr.bf16.mxu1 %v1411_v17  ;;  %v1380_v22 = vld [vmem:[#allocation2 + $0x180] ss:$8 sps:$4 sm:$0xff]   ;;  %v1422_v23 = vld [vmem:[#allocation2 + $0x10] ss:$8 sps:$4 sm:$0xff]  }
  0x1b   :  { %756 = vmatprep.mubr.bf16.mxu0 %v75_v16  ;;  %684 = vmatpush1.bf16.msra.mxu1 %v1416_v20  ;;  %v1423_v24 = vld [vmem:[#allocation2 + $0x24] ss:$8 sps:$4 sm:$0xff]   ;;  %v1381_v25 = vld [vmem:[#allocation2 + $0x194] ss:$8 sps:$4 sm:$0xff]   ;;  %v1428_v26 = vld [vmem:[#allocation2 + $0x20] ss:$8 sps:$4 sm:$0xff]  }
  0x1c   :  { %685 = vmatprep.subr.bf16.mxu1 %v1417_v21  ;;  %v1429_v27 = vld [vmem:[#allocation2 + $0x34] ss:$8 sps:$4 sm:$0xff]   ;;  %v1383_v28 = vld [vmem:[#allocation2 + $0x190] ss:$8 sps:$4 sm:$0xff]   ;;  %v1384_v29 = vld [vmem:[#allocation2 + $0x1a4] ss:$8 sps:$4 sm:$0xff]  }
  0x1d   :  { %729 = vmatpush1.bf16.msra.mxu0 %v1362_v5  ;;  %v1434_v30 = vld [vmem:[#allocation2 + $0x30] ss:$8 sps:$4 sm:$0xff]   ;;  %v1435_v31 = vld [vmem:[#allocation2 + $0x44] ss:$8 sps:$4 sm:$0xff]   ;;  %v1386_v32 = vld [vmem:[#allocation2 + $0x1a0] ss:$8 sps:$4 sm:$0xff]  }
  0x1e   :  { %730 = vmatprep.subr.bf16.mxu0 %v1363_v6  ;;  %v1387_v33 = vld [vmem:[#allocation2 + $0x1b4] ss:$8 sps:$4 sm:$0xff]   ;;  %v1440_v34 = vld [vmem:[#allocation2 + $0x40] ss:$8 sps:$4 sm:$0xff]   ;;  %v1389_v36 = vld [vmem:[#allocation2 + $0x1b0] ss:$8 sps:$4 sm:$0xff]  }
  0x1f   :  { %686 = vmatpush1.bf16.msra.mxu1 %v1422_v23  ;;  %v1441_v35 = vld [vmem:[#allocation2 + $0x54] ss:$8 sps:$4 sm:$0xff]   ;;  %v1390_v37 = vld [vmem:[#allocation2 + $0x1c4] ss:$8 sps:$4 sm:$0xff]   ;;  %v1446_v38 = vld [vmem:[#allocation2 + $0x50] ss:$8 sps:$4 sm:$0xff]  }
  0x20   :  { %687 = vmatprep.subr.bf16.mxu1 %v1423_v24  ;;  %v1447_v39 = vld [vmem:[#allocation2 + $0x64] ss:$8 sps:$4 sm:$0xff]   ;;  %v1392_v40 = vld [vmem:[#allocation2 + $0x1c0] ss:$8 sps:$4 sm:$0xff]   ;;  %v1393_v41 = vld [vmem:[#allocation2 + $0x1d4] ss:$8 sps:$4 sm:$0xff]  }
  0x21   :  { %731 = vmatpush1.bf16.msra.mxu0 %v1365_v7  ;;  %v1452_v42 = vld [vmem:[#allocation2 + $0x60] ss:$8 sps:$4 sm:$0xff]   ;;  %v1453_v43 = vld [vmem:[#allocation2 + $0x74] ss:$8 sps:$4 sm:$0xff]   ;;  %v1395_v44 = vld [vmem:[#allocation2 + $0x1d0] ss:$8 sps:$4 sm:$0xff]  }
  0x22   :  { %732 = vmatprep.subr.bf16.mxu0 %v1366_v8  ;;  %v1396_v45 = vld [vmem:[#allocation2 + $0x1e4] ss:$8 sps:$4 sm:$0xff]   ;;  %v1458_v46 = vld [vmem:[#allocation2 + $0x70] ss:$8 sps:$4 sm:$0xff]   ;;  %v1398_v48 = vld [vmem:[#allocation2 + $0x1e0] ss:$8 sps:$4 sm:$0xff]  }
  0x23   :  { %688 = vmatpush1.bf16.msra.mxu1 %v1428_v26  ;;  %v1459_v47 = vld [vmem:[#allocation2 + $0x84] ss:$8 sps:$4 sm:$0xff]   ;;  %v1399_v49 = vld [vmem:[#allocation2 + $0x1f4] ss:$8 sps:$4 sm:$0xff]   ;;  %v1464_v51 = vld [vmem:[#allocation2 + $0x80] ss:$8 sps:$4 sm:$0xff]  }
  0x24   :  { %689 = vmatprep.subr.bf16.mxu1 %v1429_v27  ;;  %v1402_v50 = vld [vmem:[%s1758_s0 + $0x8] ss:$28 sps:$4 sm:$0xff]   ;;  %v1465_v52 = vld [vmem:[#allocation2 + $0x94] ss:$8 sps:$4 sm:$0xff]   ;;  %v1401_v53 = vld [vmem:[#allocation2 + $0x1f0] ss:$8 sps:$4 sm:$0xff]  }
  0x25   :  { %733 = vmatpush1.bf16.msra.mxu0 %v1368_v9  ;;  %v1407_v54 = vld [vmem:[#allocation2 + $0x204] ss:$8 sps:$4 sm:$0xff]   ;;  %v1470_v55 = vld [vmem:[#allocation2 + $0x90] ss:$8 sps:$4 sm:$0xff]   ;;  %v74_v56 = vpack.c.bf16 %v1402_v50, %v1402_v50  ;;  %v1405_v58 = vld [vmem:[#allocation2 + $0x200] ss:$8 sps:$4 sm:$0xff]  }
  0x26   :  { %734 = vmatprep.subr.bf16.mxu0 %v1369_v10  ;;  %v1471_v57 = vld [vmem:[#allocation2 + $0xa4] ss:$8 sps:$4 sm:$0xff]   ;;  %v1497_v59 = vld [vmem:[%s1758_s0 + $0x14] ss:$28 sps:$4 sm:$0xff]   ;;  %v1476_v61 = vld [vmem:[#allocation2 + $0xa0] ss:$8 sps:$4 sm:$0xff]  }
  0x27   :  { %690 = vmatpush1.bf16.msra.mxu1 %v1434_v30  ;;  %v1410_v60 = vld [vmem:[#allocation2 + $0x214] ss:$8 sps:$4 sm:$0xff]   ;;  %v77_v62 = vpack.c.bf16 %v1497_v59, %v1497_v59  ;;  %v1408_v0 = vld [vmem:[#allocation2 + $0x210] ss:$8 sps:$4 sm:$0xff]   ;;  %v1415_v1 = vld [vmem:[#allocation2 + $0x224] ss:$8 sps:$4 sm:$0xff]  }
  0x28   :  { %691 = vmatprep.subr.bf16.mxu1 %v1435_v31  ;;  %v1477_v63 = vld [vmem:[#allocation2 + $0xb4] ss:$8 sps:$4 sm:$0xff]   ;;  %v1482_v2 = vld [vmem:[#allocation2 + $0xb0] ss:$8 sps:$4 sm:$0xff]   ;;  %v1509_v3 = vld [vmem:[%s1758_s0 + $0x4] ss:$28 sps:$4 sm:$0xff]  }
  0x29   :  { %735 = vmatpush1.bf16.msra.mxu0 %v1371_v11  ;;  %v1483_v4 = vld [vmem:[#allocation2 + $0xc4] ss:$8 sps:$4 sm:$0xff]   ;;  %v1413_v5 = vld [vmem:[#allocation2 + $0x220] ss:$8 sps:$4 sm:$0xff]   ;;  %v73_v6 = vpack.c.bf16 %v1509_v3, %v1509_v3  ;;  %v1421_v7 = vld [vmem:[#allocation2 + $0x234] ss:$8 sps:$4 sm:$0xff]  }
  0x2a   :  { %736 = vmatprep.subr.bf16.mxu0 %v1372_v12  ;;  %v1488_v8 = vld [vmem:[#allocation2 + $0xc0] ss:$8 sps:$4 sm:$0xff]   ;;  %v1489_v9 = vld [vmem:[#allocation2 + $0xd4] ss:$8 sps:$4 sm:$0xff]   ;;  %v1419_v10 = vld [vmem:[#allocation2 + $0x230] ss:$8 sps:$4 sm:$0xff]  }
  0x2b   :  { %692 = vmatpush1.bf16.msra.mxu1 %v1440_v34  ;;  %715 = vmatprep.mubr.bf16.mxu1 %v73_v6  ;;  %v1427_v11 = vld [vmem:[#allocation2 + $0x244] ss:$8 sps:$4 sm:$0xff]   ;;  %v1425_v12 = vld [vmem:[#allocation2 + $0x240] ss:$8 sps:$4 sm:$0xff]   ;;  %v1494_v13 = vld [vmem:[#allocation2 + $0xd0] ss:$8 sps:$4 sm:$0xff]   ;;  %v179_v6 = vlaneseq }
  0x2c   :  { %693 = vmatprep.subr.bf16.mxu1 %v1441_v35  ;;  %v1503_v16 = vld [vmem:[#allocation2 + $0xe0] ss:$8 sps:$4 sm:$0xff]   ;;  %v1504_v17 = vld [vmem:[#allocation2 + $0xf4] ss:$8 sps:$4 sm:$0xff]   ;;  %v1506_v21 = vld [vmem:[#allocation2 + $0xf0] ss:$8 sps:$4 sm:$0xff]  }
  0x2d   :  { %737 = vmatpush1.bf16.msra.mxu0 %v1374_v14  ;;  %v1498_v14 = vld [vmem:[#allocation2 + $0xe4] ss:$8 sps:$4 sm:$0xff]   ;;  %v1507_v20 = vld [vmem:[%s1758_s0] ss:$28 sps:$4 sm:$0xff]   ;;  %v1515_v31 = vld [vmem:[%s1761_s3 + $0x50] sm:$0xff]   ;;  %vm679_vm0 = vcmask 130048  }
  0x2e   :  { %738 = vmatprep.subr.bf16.mxu0 %v1375_v15  ;;  %v1433_v15 = vld [vmem:[#allocation2 + $0x254] ss:$8 sps:$4 sm:$0xff]   ;;  %v1437_v23 = vld [vmem:[#allocation2 + $0x260] ss:$8 sps:$4 sm:$0xff]   ;;  %v72_v26 = vpack.c.bf16 %v1507_v20, %v1507_v20  ;;  %vm1588_vm1 = vmmov 0  }
  0x2f   :  { %694 = vmatpush1.bf16.msra.mxu1 %v1446_v38  ;;  %v1445_v24 = vld [vmem:[#allocation2 + $0x274] ss:$8 sps:$4 sm:$0xff]   ;;  %v1513_v27 = vld [vmem:[%s1761_s3 + $0x48] sm:$0xff]  }
  0x30   :  { %695 = vmatprep.subr.bf16.mxu1 %v1447_v39  ;;  %v1514_v30 = vld [vmem:[%s1761_s3 + $0x8] sm:$0xff]   ;;  %v1516_v34 = vld [vmem:[%s1761_s3 + $0x10] sm:$0xff]   ;;  %v1517_v35 = vld [vmem:[%s1761_s3 + $0x58] sm:$0xff]  }
  0x31   :  { %739 = vmatpush1.bf16.msra.mxu0 %v1377_v18  ;;  %v1431_v18 = vld [vmem:[#allocation2 + $0x250] ss:$8 sps:$4 sm:$0xff]   ;;  %v1519_v39 = vld [vmem:[%s1761_s3 + $0x60] sm:$0xff]   ;;  %v1493_v50 = vld [vmem:[#allocation2 + $0x2f4] ss:$8 sps:$4 sm:$0xff]  }
  0x32   :  { %740 = vmatprep.subr.bf16.mxu0 %v1378_v19  ;;  %v1439_v19 = vld [vmem:[#allocation2 + $0x264] ss:$8 sps:$4 sm:$0xff]   ;;  %v1518_v38 = vld [vmem:[%s1761_s3 + $0x18] sm:$0xff]  }
  0x33   :  { %696 = vmatpush1.bf16.msra.mxu1 %v1452_v42  ;;  %v1520_v42 = vld [vmem:[%s1761_s3 + $0x20] sm:$0xff]   ;;  %v1521_v59 = vld [vmem:[%s1761_s3 + $0x68] sm:$0xff]  }
  0x34   :  { %697 = vmatprep.subr.bf16.mxu1 %v1453_v43  ;;  %v1467_v43 = vld [vmem:[#allocation2 + $0x2b0] ss:$8 sps:$4 sm:$0xff]  }
  0x35   :  { %741 = vmatpush1.bf16.msra.mxu0 %v1380_v22  ;;  %v1511_v22 = vld [vmem:[%s1761_s3 + $0x40] sm:$0xff]  }
  0x36   :  { %742 = vmatprep.subr.bf16.mxu0 %v1381_v25  ;;  %v1512_v25 = vld [vmem:[%s1761_s3] sm:$0xff]  }
  0x37   :  { %698 = vmatpush1.bf16.msra.mxu1 %v1458_v46  ;;  %v1481_v46 = vld [vmem:[#allocation2 + $0x2d4] ss:$8 sps:$4 sm:$0xff]  }
  0x38   :  { %699 = vmatprep.subr.bf16.mxu1 %v1459_v47  ;;  %v1479_v47 = vld [vmem:[#allocation2 + $0x2d0] ss:$8 sps:$4 sm:$0xff]  }
  0x39   :  { %743 = vmatpush1.bf16.msra.mxu0 %v1383_v28  ;;  %v1443_v28 = vld [vmem:[#allocation2 + $0x270] ss:$8 sps:$4 sm:$0xff]  }
  0x3a   :  { %744 = vmatprep.subr.bf16.mxu0 %v1384_v29  ;;  %v1451_v29 = vld [vmem:[#allocation2 + $0x284] ss:$8 sps:$4 sm:$0xff]  }
  0x3b   :  { %700 = vmatpush1.bf16.msra.mxu1 %v1464_v51  ;;  %v1495_v51 = vld [vmem:[%s1758_s0 + $0x10] ss:$28 sps:$4 sm:$0xff]  }
  0x3c   :  { %701 = vmatprep.subr.bf16.mxu1 %v1465_v52  ;;  %v1491_v52 = vld [vmem:[#allocation2 + $0x2f0] ss:$8 sps:$4 sm:$0xff]  }
  0x3d   :  { %745 = vmatpush1.bf16.msra.mxu0 %v1386_v32  ;;  %v1449_v32 = vld [vmem:[#allocation2 + $0x280] ss:$8 sps:$4 sm:$0xff]  }
  0x3e   :  { %746 = vmatprep.subr.bf16.mxu0 %v1387_v33  ;;  %v1457_v33 = vld [vmem:[#allocation2 + $0x294] ss:$8 sps:$4 sm:$0xff]  }
  0x3f   :  { %702 = vmatpush1.bf16.msra.mxu1 %v1470_v55  ;;  %v1500_v55 = vld [vmem:[#allocation2 + $0x300] ss:$8 sps:$4 sm:$0xff]  }
  0x40   :  { %703 = vmatprep.subr.bf16.mxu1 %v1471_v57  ;;  %v1510_v57 = vld [vmem:[%s1758_s0 + $0x18] ss:$28 sps:$4 sm:$0xff]  }
  0x41   :  { %747 = vmatpush1.bf16.msra.mxu0 %v1389_v36  ;;  %v1455_v36 = vld [vmem:[#allocation2 + $0x290] ss:$8 sps:$4 sm:$0xff]  }
  0x42   :  { %748 = vmatprep.subr.bf16.mxu0 %v1390_v37  ;;  %v1463_v37 = vld [vmem:[#allocation2 + $0x2a4] ss:$8 sps:$4 sm:$0xff]  }
  0x43   :  { %704 = vmatpush1.bf16.msra.mxu1 %v1476_v61  ;;  %v1523_v61 = vld [vmem:[%s1761_s3 + $0x70] sm:$0xff]  }
  0x44   :  { %705 = vmatprep.subr.bf16.mxu1 %v1477_v63  ;;  %v1525_v63 = vld [vmem:[%s1761_s3 + $0x78] sm:$0xff]  }
  0x45   :  { %749 = vmatpush1.bf16.msra.mxu0 %v1392_v40  ;;  %v1461_v40 = vld [vmem:[#allocation2 + $0x2a0] ss:$8 sps:$4 sm:$0xff]  }
  0x46   :  { %750 = vmatprep.subr.bf16.mxu0 %v1393_v41  ;;  %v1469_v41 = vld [vmem:[#allocation2 + $0x2b4] ss:$8 sps:$4 sm:$0xff]  }
  0x47   :  { %706 = vmatpush1.bf16.msra.mxu1 %v1482_v2 }
  0x48   :  { %707 = vmatprep.subr.bf16.mxu1 %v1483_v4 }
  0x49   :  { %751 = vmatpush1.bf16.msra.mxu0 %v1395_v44  ;;  %v1475_v44 = vld [vmem:[#allocation2 + $0x2c4] ss:$8 sps:$4 sm:$0xff]  }
  0x4a   :  { %752 = vmatprep.subr.bf16.mxu0 %v1396_v45  ;;  %v1473_v45 = vld [vmem:[#allocation2 + $0x2c0] ss:$8 sps:$4 sm:$0xff]  }
  0x4b   :  { %708 = vmatpush1.bf16.msra.mxu1 %v1488_v8 }
  0x4c   :  { %709 = vmatprep.subr.bf16.mxu1 %v1489_v9  ;;  %v177_v9 = vld [vmem:[%s1760_s2] sm:$0x3] }
  0x4d   :  { %753 = vmatpush1.bf16.msra.mxu0 %v1398_v48  ;;  %v1487_v48 = vld [vmem:[#allocation2 + $0x2e4] ss:$8 sps:$4 sm:$0xff]  }
  0x4e   :  { %754 = vmatprep.subr.bf16.mxu0 %v1399_v49  ;;  %v1485_v49 = vld [vmem:[#allocation2 + $0x2e0] ss:$8 sps:$4 sm:$0xff]  }
  0x4f   :  { %710 = vmatpush1.bf16.msra.mxu1 %v1494_v13 }
  0x50   :  { %711 = vmatprep.subr.bf16.mxu1 %v1498_v14 }
  0x51   :  { %755 = vmatpush1.bf16.msra.mxu0 %v1401_v53  ;;  %v1502_v53 = vld [vmem:[#allocation2 + $0x304] ss:$8 sps:$4 sm:$0xff]  }
  0x52   :  { %765 = vmatprep.subr.bf16.mxu0 %v1407_v54  ;;  %v76_v54 = vpack.c.bf16 %v1495_v51, %v1495_v51 }
  0x53   :  { %712 = vmatpush1.bf16.msra.mxu1 %v1503_v16 }
  0x54   :  { %757 = vmatmul.mubr.bf16.vlgmr.msra.gmra.mrb[0].mxu0 %v74_v56  ;;  %713 = vmatprep.subr.bf16.mxu1 %v1504_v17  ;;  %v1586_v56 = vmov 0  }
  0x55   :  { %766 = vmatpush1.bf16.msra.mxu0 %v1405_v58  ;;  %797 = vmatprep.mubr.bf16.mxu0 %v77_v62  ;;  %v78_v58 = vpack.c.bf16 %v1510_v57, %v1510_v57  ;;  %v1524_v62 = vld [vmem:[%s1761_s3 + $0x30] sm:$0xff]  }
  0x56   :  { %767 = vmatprep.subr.bf16.mxu0 %v1410_v60  ;;  %v1522_v60 = vld [vmem:[%s1761_s3 + $0x28] sm:$0xff]  }
  0x57   :  { %714 = vmatpush1.bf16.msra.mxu1 %v1506_v21 }
  0x58   :  { %1282 = vmatprep.subr.bf16.mxu1 %v1511_v22 }
  0x59   :  { %768 = vmatpush1.bf16.msra.mxu0 %v1408_v0  ;;  %v1526_v0 = vld [vmem:[%s1761_s3 + $0x38] sm:$0xff]  }
  0x5a   :  { %769 = vmatprep.subr.bf16.mxu0 %v1415_v1  ;;  %716 = vmatmul.mubr.bf16.vlgmr.msra.gmra.mrb[0].mxu1 %v72_v26  ;;  %v1587_v1 = vmov 0.0   ;;  %v1528_v26 = vld [vmem:[%s1763_s5 + $0x8] sm:$0xff]  }
  0x5b   :  { %1283 = vmatpush3.bf16.msra.mxu1 %v1512_v25 }
  0x5c   :  { %1284 = vmatprep.subr.bf16.mxu1 %v1513_v27  ;;  %v1529_v27 = vld [vmem:[%s1763_s5 + $0x10] sm:$0xff]  }
  0x5d   :  { %770 = vmatpush1.bf16.msra.mxu0 %v1413_v5 }
  0x5e   :  { %771 = vmatprep.subr.bf16.mxu0 %v1421_v7  ;;  %v180_v7 = vshrl.u32 %v179_v6, 7 }
  0x5f   :  { %1285 = vmatpush3.bf16.msra.mxu1 %v1514_v30  ;;  %v1532_v30 = vld [vmem:[%s1763_s5 + $0x28] sm:$0xff]  }
  0x60   :  { %1286 = vmatprep.subr.bf16.mxu1 %v1515_v31  ;;  %v181_v8 = vsub.s32 0, %v180_v7  ;;  %v1533_v31 = vld [vmem:[%s1763_s5 + $0x30] sm:$0xff]  }
  0x61   :  { %772 = vmatpush1.bf16.msra.mxu0 %v1419_v10  ;;  %v185_v10 = vsub.s32 1, %v180_v7 }
  0x62   :  { %773 = vmatprep.subr.bf16.mxu0 %v1427_v11  ;;  %v182_v11 = vrot.slane %v177_v9, %v181_v8 }
  0x63   :  { %1287 = vmatpush3.bf16.msra.mxu1 %v1516_v34  ;;  %v1256_v34 = vld [vmem:[%s1762_s4] ss:$0 sm:$0xff] }
  0x64   :  { %1288 = vmatprep.subr.bf16.mxu1 %v1517_v35 }
  0x65   :  { %774 = vmatpush1.bf16.msra.mxu0 %v1425_v12  ;;  %v186_v12 = vrot.slane %v177_v9, %v185_v10 }
  0x66   :  { %775 = vmatprep.subr.bf16.mxu0 %v1433_v15 }
  0x67   :  { %1289 = vmatpush3.bf16.msra.mxu1 %v1518_v38 }
  0x68   :  { %1290 = vmatprep.subr.bf16.mxu1 %v1519_v39 }
  0x69   :  { %776 = vmatpush1.bf16.msra.mxu0 %v1431_v18 }
  0x6a   :  { %777 = vmatprep.subr.bf16.mxu0 %v1439_v19 }
  0x6b   :  { %1291 = vmatpush3.bf16.msra.mxu1 %v1520_v42  ;;  %v1273_v42 = vld [vmem:[%s1764_s6] ss:$0 sm:$0xff] }
  0x6c   :  { %1292 = vmatprep.subr.bf16.mxu1 %v1521_v59 }
  0x6d   :  { %778 = vmatpush1.bf16.msra.mxu0 %v1437_v23 }
  0x6e   :  { %779 = vmatprep.subr.bf16.mxu0 %v1445_v24  ;;  %v1527_v24 = vld [vmem:[%s1763_s5] sm:$0xff]  }
  0x6f   :  { %1293 = vmatpush3.bf16.msra.mxu1 %v1522_v60 }
  0x70   :  { %1294 = vmatprep.subr.bf16.mxu1 %v1523_v61 }
  0x71   :  { %780 = vmatpush1.bf16.msra.mxu0 %v1443_v28  ;;  %v1530_v28 = vld [vmem:[%s1763_s5 + $0x18] sm:$0xff]  }
  0x72   :  { %781 = vmatprep.subr.bf16.mxu0 %v1451_v29  ;;  %v1531_v29 = vld [vmem:[%s1763_s5 + $0x20] sm:$0xff]  }
  0x73   :  { %1295 = vmatpush3.bf16.msra.mxu1 %v1524_v62 }
  0x74   :  { %1296 = vmatprep.subr.bf16.mxu1 %v1525_v63 }
  0x75   :  { %782 = vmatpush1.bf16.msra.mxu0 %v1449_v32  ;;  %v1534_v32 = vld [vmem:[%s1763_s5 + $0x38] sm:$0xff]  }
  0x76   :  { %783 = vmatprep.subr.bf16.mxu0 %v1457_v33 }
  0x77   :  { %1297 = vmatpush3.bf16.msra.mxu1 %v1526_v0 }
  0x78   :  { %1313 = vmatprep.subr.bf16.mxu1 %v1587_v1 }
  0x79   :  { %784 = vmatpush1.bf16.msra.mxu0 %v1455_v36 }
  0x7a   :  { %785 = vmatprep.subr.bf16.mxu0 %v1463_v37 }
  0x7d   :  { %786 = vmatpush1.bf16.msra.mxu0 %v1461_v40 }
  0x7e   :  { %787 = vmatprep.subr.bf16.mxu0 %v1469_v41 }
  0x81   :  { %788 = vmatpush1.bf16.msra.mxu0 %v1467_v43 }
  0x82   :  { %789 = vmatprep.subr.bf16.mxu0 %v1475_v44 }
  0x85   :  { %790 = vmatpush1.bf16.msra.mxu0 %v1473_v45 }
  0x86   :  { %791 = vmatprep.subr.bf16.mxu0 %v1481_v46 }
  0x89   :  { %792 = vmatpush1.bf16.msra.mxu0 %v1479_v47 }
  0x8a   :  { %793 = vmatprep.subr.bf16.mxu0 %v1487_v48 }
  0x8d   :  { %794 = vmatpush1.bf16.msra.mxu0 %v1485_v49 }
  0x8e   :  { %795 = vmatprep.subr.bf16.mxu0 %v1493_v50 }
  0x91   :  { %796 = vmatpush1.bf16.msra.mxu0 %v1491_v52 }
  0x92   :  { %806 = vmatprep.subr.bf16.mxu0 %v1502_v53 }
  0x94   :  { %798 = vmatmul.mubr.bf16.vlgmr.msra.gmra.mrb[0].mxu0 %v76_v54 }
  0x95   :  { %807 = vmatpush1.bf16.msra.mxu0 %v1500_v55  ;;  %838 = vmatprep.mubr.bf16.mxu0 %v1586_v56 }
  0xa0   :  { %1255 = vmatmul.mubr.msk.bf16.vlgmr.msra.gmra.mrb[0].mxu0 %vm679_vm0, %v78_v58 }
 0x12d   :  { %v717_v2 = vpop.f32.mrb[0].mxu1 }
 0x12e   :  { %v719_v3 = vpop.f32.mrb[1].mxu1  ;;  %v718_v13 = vadd.f32 %v717_v2, %v182_v11 }
 0x12f   :  { %v721_v4 = vpop.f32.mrb[2].mxu1  ;;  %v720_v14 = vadd.f32 %v719_v3, %v186_v12 }
 0x130   :  { %v722_v5 = vpop.f32.mrb[3].mxu1 }
 0x173   :  { %v840_v15 = vpop.f32.mrb[0].mxu0 }
 0x174   :  { %v1334_v16 = vadd.f32 %v840_v15, %v718_v13  ;;  %v842_v17 = vpop.f32.mrb[1].mxu0 }
 0x175   :  { %v1336_v18 = vadd.f32 %v842_v17, %v720_v14  ;;  %v844_v19 = vpop.f32.mrb[2].mxu0 }
 0x176   :  { %v847_v20 = vmul.f32 %v1334_v16, %v1334_v16  ;;  %v845_v21 = vpop.f32.mrb[3].mxu0 }
 0x177   :  { %v848_v22 = vmul.f32 %v1336_v18, %v1336_v18 }
 0x178   :  { %v849_v25 = vpack.c.bf16 %v847_v20, %v847_v20 }
 0x179   :  { %v850_v23 = vpack.c.bf16 %v848_v22, %v848_v22 }
 0x17b   :  { %1018 = vmatprep.mubr.bf16.mxu1 %v850_v23 }
 0x17c   :  { %1019 = vmatmul.mubr.bf16.vlgmr.msra.gmra.mrb[4].mxu1 %v849_v25 }
 0x17d   :  { %1314 = vmatpush3.bf16.msra.mxu1 %v1527_v24  ;;  %1329 = vmatprep.mubr.msk.bf16.mxu1 %vm1588_vm1, %v1587_v1 }
 0x17e   :  { %1315 = vmatprep.subr.bf16.mxu1 %v1587_v1 }
 0x181   :  { %1316 = vmatpush3.bf16.msra.mxu1 %v1528_v26 }
 0x182   :  { %1317 = vmatprep.subr.bf16.mxu1 %v1587_v1 }
 0x185   :  { %1318 = vmatpush3.bf16.msra.mxu1 %v1529_v27 }
 0x186   :  { %1319 = vmatprep.subr.bf16.mxu1 %v1587_v1 }
 0x189   :  { %1320 = vmatpush3.bf16.msra.mxu1 %v1530_v28 }
 0x18a   :  { %1321 = vmatprep.subr.bf16.mxu1 %v1587_v1 }
 0x18d   :  { %1322 = vmatpush3.bf16.msra.mxu1 %v1531_v29 }
 0x18e   :  { %1323 = vmatprep.subr.bf16.mxu1 %v1587_v1 }
 0x191   :  { %1324 = vmatpush3.bf16.msra.mxu1 %v1532_v30 }
 0x192   :  { %1325 = vmatprep.subr.bf16.mxu1 %v1587_v1 }
 0x195   :  { %1326 = vmatpush3.bf16.msra.mxu1 %v1533_v31 }
 0x196   :  { %1327 = vmatprep.subr.bf16.mxu1 %v1587_v1 }
 0x199   :  { %1328 = vmatpush3.bf16.msra.mxu1 %v1534_v32 }
 0x24f   :  { %v1298_v33 = vpop.f32.mrb[4].mxu1 }
 0x250   :  { %v1299_v35 = vpop.f32.mrb[5].mxu1 }
 0x251   :  { %v1300_v36 = vadd.f32 %v1299_v35, %v1298_v33  ;;  %v1301_v37 = vpop.f32.mrb[6].mxu1 }
 0x252   :  { %v1302_v38 = vpop.f32.mrb[7].mxu1 }
 0x253   :  { %v1021_v39 = vadd.f32 %v1300_v36, %v1256_v34 }
 0x255   :  { %v1026_v40 = vmul.f32 %v1021_v39, %v1021_v39 }
 0x257   :  { %v1027_v41 = vpack.c.bf16 %v1026_v40, %v1026_v40 }
 0x259   :  { %1330 = vmatmul.mubr.bf16.vlgmr.msra.gmra.mrb[8].mxu1 %v1027_v41 }
 0x32c   :  { %v1133_v43 = vpop.f32.mrb[8].mxu1 }
 0x32d   :  { %v1134_v44 = vadd.f32 %v1273_v42, %v1133_v43  ;;  %v1331_v45 = vpop.f32.mrb[9].mxu1 }
 0x32e   :  { %v1136_v46 = vpop.f32.mrb[10].mxu1 }
 0x32f   :  { %1139 = vst [vmem:[#allocation5] sm:$0xff] %v1134_v44  ;;  %v1332_v47 = vpop.f32.mrb[11].mxu1 }
 0x330   :  { %1144 = vsyncadd [#allocation4], 64  ;;  %s1589_s4 = smov [#allocation5]  }
 0x331   :  { %s1145_s5 = sshll.u32 %s1589_s4, 4  ;;  %s1146_s5 = int_to_ptr.vmem [resolvable:$true] %s1145_s5 }
 0x332   :  { %s1557_s8 = scalar_lea.vmem %s1146_s5, 64  ;;  %s1561_s0 = scalar_lea.vmem %s1146_s5, 128 }
 0x333   :  { %p1558_p8 = scmp.ne.s32.totalorder %s1146_s5, %s1557_s8  ;;  %p1562_p9 = scmp.lt.s32.totalorder %s1146_s5, %s1146_s5 }
 0x334   :  { %p1563_p10 = scmp.lt.s32.totalorder %s1561_s0, %s1557_s8 }
 0x336   :  { %p1564_p11 = por %p1563_p10, %p1562_p9 }
 0x338   :  { %p1565_p12 = pnand %p1564_p11, %p1558_p8 }
 0x33a   :  { %1568 = shalt.err (!%p1565_p12)
}
 0x33b   :  { %s1569_s10 = scalar_lea.hbm %s1765_s7, 64 }
 0x33c   :  { %p1570_p13 = scmp.ne.s32.totalorder %s1765_s7, %s1569_s10  ;;  %p1573_p0 = scmp.lt.u32.totalorder %s1569_s10, %s1765_s7 }
 0x33e   :  { %p1575_p1 = pnand %p1573_p0, %p1570_p13 }
 0x340   :  { %1578 = shalt.err (!%p1575_p1)
}
 0x341   :  { %s1590_s14 = smov 64   ;;  %s1591_s2 = smov 4  }
 0x342   :  { %1151 = dma.vmem_to_hbm [thread:$0]  %s1146_s5, 64, %s1765_s7, [#allocation4], %s1590_s14, %s1590_s14, %s1591_s2  }
 0x343   :  { %1581 = dma.done.wait [#allocation4], 128  }
 0x344   :  { %1582 = vsyncadd [#allocation4], 4294967168 }
 0x345   :  { %1155 = vsyncpa [#allocation3], 1 }
 0x346   :  { %1156 = vsyncpa [#allocation4], 1 }

</bundles_post_ra>
